<compile_context>
chip_gen: v6e
topology: v6e:2x2x1
jax: 0.10.0
libtpu: 0.0.40
codegen_flags: <defaults>
</compile_context>

<pallas_src>
import jax
import jax.numpy as jnp
from jax.experimental import pallas as pl
from jax.experimental.pallas import tpu as pltpu


def _seg_kernel(patches_ref, w1_ref, b1_ref, w2_ref, b2_ref, out_ref):
    # patches_ref : (9*C, TP)            bf16 im2col patches, pixels on lanes
    # w1_ref      : (hidden, 9*C)        bf16 fused 3x3 conv weights
    # b1_ref      : (hidden, 1)          f32
    # w2_ref      : (num_classes, hidden) bf16 1x1 conv weights
    # b2_ref      : (num_classes, 1)     f32
    # out_ref     : (1, TP) int32        lane-dense per-pixel class ids
    feat = jnp.dot(w1_ref[...], patches_ref[...],
                   preferred_element_type=jnp.float32)            # (hidden, TP)
    feat = jnp.maximum(feat + b1_ref[...], 0.0)                   # bias + ReLU (f32)

    logits = jnp.dot(w2_ref[...], feat.astype(w2_ref.dtype),
                     preferred_element_type=jnp.float32) + b2_ref[...]  # (ncls, TP)

    # Unrolled argmax over the (small) class axis: pure compare/select.
    # Strict '>' keeps the first index on ties (matches jnp/torch argmax).
    num_classes = logits.shape[0]
    best_val = logits[0:1, :]                                     # (1, TP)
    best_idx = jnp.zeros_like(best_val, dtype=jnp.int32)
    for c in range(1, num_classes):
        v = logits[c:c + 1, :]
        better = v > best_val
        best_val = jnp.where(better, v, best_val)
        best_idx = jnp.where(better, jnp.int32(c), best_idx)

    out_ref[...] = best_idx


def _pick_pixel_tile(hw, max_px=32 * 1024):
    """Largest multiple-of-128 divisor of hw, preferring >=2 grid steps
    (feeds both v7x TensorCores and bounds VMEM); falls back to full extent."""
    best = None
    cap = min(max_px, hw // 2)
    t = 128
    while t <= cap:
        if hw % t == 0:
            best = t
        t += 128
    return best if best is not None else hw


def exportable_segmentor_forward(x_nchw, w1, b1, w2, b2):
    """x_nchw: (B, C, H, W) float32. Returns the (H, W) int32 class map for
    image 0 (matching `segmentor.forward(...)[0]` in the PyTorch module)."""
    B, C, H, W = x_nchw.shape
    hidden = w1.shape[0]          # w1: (hidden, C, 3, 3)  PyTorch conv layout
    num_classes = w2.shape[0]     # w2: (num_classes, hidden, 1, 1)
    HW = H * W

    # ---- glue (plain JAX): only image 0, im2col, weight reshape, bf16 cast ----
    x0 = jnp.transpose(x_nchw[0], (1, 2, 0))                      # (H, W, C)
    x_pad = jnp.pad(x0, ((1, 1), (1, 1), (0, 0)))                 # (H+2, W+2, C)
    taps = [x_pad[dy:dy + H, dx:dx + W, :].reshape(HW, C).T       # (C, HW) / tap
            for dy in range(3) for dx in range(3)]
    patches = jnp.concatenate(taps, axis=0).astype(jnp.bfloat16)  # (9*C, HW)

    # (hidden, C, 3, 3) -> (hidden, 3, 3, C) -> (hidden, 9*C); tap-major K
    # matching the patch-row ordering above.
    w1_k = jnp.transpose(w1, (0, 2, 3, 1)).reshape(hidden, 9 * C).astype(jnp.bfloat16)
    b1_k = b1.reshape(hidden, 1).astype(jnp.float32)
    w2_k = w2.reshape(num_classes, hidden).astype(jnp.bfloat16)
    b2_k = b2.reshape(num_classes, 1).astype(jnp.float32)

    TP = _pick_pixel_tile(HW)          # pixels per grid step (multiple of 128)
    grid = (HW // TP,)

    preds = pl.pallas_call(
        _seg_kernel,
        out_shape=jax.ShapeDtypeStruct((1, HW), jnp.int32),
        grid_spec=pltpu.PrefetchScalarGridSpec(
            num_scalar_prefetch=0,
            grid=grid,
            in_specs=[
                pl.BlockSpec((9 * C, TP), lambda i: (0, i)),          # patches
                pl.BlockSpec((hidden, 9 * C), lambda i: (0, 0)),      # w1
                pl.BlockSpec((hidden, 1), lambda i: (0, 0)),          # b1
                pl.BlockSpec((num_classes, hidden), lambda i: (0, 0)),  # w2
                pl.BlockSpec((num_classes, 1), lambda i: (0, 0)),     # b2
            ],
            out_specs=pl.BlockSpec((1, TP), lambda i: (0, i)),
        ),
        compiler_params=pltpu.CompilerParams(
            dimension_semantics=("parallel",)),
    )(patches, w1_k, b1_k, w2_k, b2_k)

    # mmseg returns per-image (H, W) maps; the module takes element [0].
    return preds.reshape(H, W)


if __name__ == "__main__":
    # Small shapes consistent with the forward: (B, C, H, W) image input.
    B, C, H, W = 2, 4, 16, 16
    hidden, num_classes = 32, 8

    key = jax.random.PRNGKey(0)
    kx, k1, kb1, k2, kb2 = jax.random.split(key, 5)

    x = jax.random.normal(kx, (B, C, H, W), dtype=jnp.float32)

    # Deterministic synthetic parameters (PyTorch conv weight layouts).
    w1 = 0.1 * jax.random.normal(k1, (hidden, C, 3, 3), dtype=jnp.float32)
    b1 = 0.01 * jax.random.normal(kb1, (hidden,), dtype=jnp.float32)
    w2 = 0.1 * jax.random.normal(k2, (num_classes, hidden, 1, 1), dtype=jnp.float32)
    b2 = 0.01 * jax.random.normal(kb2, (num_classes,), dtype=jnp.float32)

    out = exportable_segmentor_forward(x, w1, b1, w2, b2)
    out = jax.block_until_ready(out)

    assert out.shape == (H, W) and out.dtype == jnp.int32
    print("KERNEL_OK")
</pallas_src>

<mosaic_0001>
module attributes {stable_mosaic.version = 11 : i64} {
  func.func @_seg_kernel(%arg0: i32, %arg1: memref<36x128xbf16, #tpu.memory_space<vmem>>, %arg2: memref<32x36xbf16, #tpu.memory_space<vmem>>, %arg3: memref<32x1xf32, #tpu.memory_space<vmem>>, %arg4: memref<8x32xbf16, #tpu.memory_space<vmem>>, %arg5: memref<8x1xf32, #tpu.memory_space<vmem>>, %arg6: memref<1x128xi32, #tpu.memory_space<vmem>>) attributes {dimension_semantics = [#tpu.dimension_semantics<parallel>], iteration_bounds = array<i64: 2>, scalar_prefetch = 0 : i64, scratch_operands = 0 : i64, tpu.core_type = #tpu.core_type<tc>, window_params = [{transform_indices = @transform_0, window_bounds = array<i64: 36, 128>}, {pipeline_mode = #tpu.pipeline_mode<synchronous>, transform_indices = @transform_1, window_bounds = array<i64: 32, 36>}, {pipeline_mode = #tpu.pipeline_mode<synchronous>, transform_indices = @transform_2, window_bounds = array<i64: 32, 1>}, {pipeline_mode = #tpu.pipeline_mode<synchronous>, transform_indices = @transform_3, window_bounds = array<i64: 8, 32>}, {pipeline_mode = #tpu.pipeline_mode<synchronous>, transform_indices = @transform_4, window_bounds = array<i64: 8, 1>}, {transform_indices = @transform_5, window_bounds = array<i64: 1, 128>}]} {
    %c0 = arith.constant 0 : index
    %c0_0 = arith.constant 0 : index
    %0 = vector.load %arg2[%c0, %c0_0] : memref<32x36xbf16, #tpu.memory_space<vmem>>, vector<32x36xbf16>
    %c0_1 = arith.constant 0 : index
    %c0_2 = arith.constant 0 : index
    %1 = vector.load %arg1[%c0_1, %c0_2] : memref<36x128xbf16, #tpu.memory_space<vmem>>, vector<36x128xbf16>
    %cst = arith.constant dense<0.000000e+00> : vector<32x128xf32>
    %2 = tpu.matmul %0, %1, %cst {dimension_numbers = #tpu.dot_dimension_numbers<[1], [0], [0], [1], [0, 0, 1, 1], [], []>} : vector<32x36xbf16>, vector<36x128xbf16>, vector<32x128xf32> -> vector<32x128xf32>
    %c0_3 = arith.constant 0 : index
    %c0_4 = arith.constant 0 : index
    %3 = vector.load %arg3[%c0_3, %c0_4] : memref<32x1xf32, #tpu.memory_space<vmem>>, vector<32x1xf32>
    %4 = vector.broadcast %3 : vector<32x1xf32> to vector<32x128xf32>
    %5 = arith.addf %2, %4 : vector<32x128xf32>
    %cst_5 = arith.constant 0.000000e+00 : f32
    %6 = vector.broadcast %cst_5 : f32 to vector<32x128xf32>
    %7 = arith.maximumf %5, %6 : vector<32x128xf32>
    %c0_6 = arith.constant 0 : index
    %c0_7 = arith.constant 0 : index
    %8 = vector.load %arg4[%c0_6, %c0_7] : memref<8x32xbf16, #tpu.memory_space<vmem>>, vector<8x32xbf16>
    %9 = arith.truncf %7 : vector<32x128xf32> to vector<32x128xbf16>
    %cst_8 = arith.constant dense<0.000000e+00> : vector<8x128xf32>
    %10 = tpu.matmul %8, %9, %cst_8 {dimension_numbers = #tpu.dot_dimension_numbers<[1], [0], [0], [1], [0, 0, 1, 1], [], []>} : vector<8x32xbf16>, vector<32x128xbf16>, vector<8x128xf32> -> vector<8x128xf32>
    %c0_9 = arith.constant 0 : index
    %c0_10 = arith.constant 0 : index
    %11 = vector.load %arg5[%c0_9, %c0_10] : memref<8x1xf32, #tpu.memory_space<vmem>>, vector<8x1xf32>
    %12 = vector.broadcast %11 : vector<8x1xf32> to vector<8x128xf32>
    %13 = arith.addf %10, %12 : vector<8x128xf32>
    %14 = vector.extract_strided_slice %13 {offsets = [0, 0], sizes = [1, 128], strides = [1, 1]} : vector<8x128xf32> to vector<1x128xf32>
    %c0_i32 = arith.constant 0 : i32
    %15 = vector.broadcast %c0_i32 : i32 to vector<1x128xi32>
    %16 = vector.extract_strided_slice %13 {offsets = [1, 0], sizes = [1, 128], strides = [1, 1]} : vector<8x128xf32> to vector<1x128xf32>
    %17 = arith.cmpf ogt, %16, %14 : vector<1x128xf32>
    %18 = arith.select %17, %16, %14 : vector<1x128xi1>, vector<1x128xf32>
    %c1_i32 = arith.constant 1 : i32
    %19 = vector.broadcast %c1_i32 : i32 to vector<1x128xi32>
    %20 = arith.select %17, %19, %15 : vector<1x128xi1>, vector<1x128xi32>
    %21 = vector.extract_strided_slice %13 {offsets = [2, 0], sizes = [1, 128], strides = [1, 1]} : vector<8x128xf32> to vector<1x128xf32>
    %22 = arith.cmpf ogt, %21, %18 : vector<1x128xf32>
    %23 = arith.select %22, %21, %18 : vector<1x128xi1>, vector<1x128xf32>
    %c2_i32 = arith.constant 2 : i32
    %24 = vector.broadcast %c2_i32 : i32 to vector<1x128xi32>
    %25 = arith.select %22, %24, %20 : vector<1x128xi1>, vector<1x128xi32>
    %26 = vector.extract_strided_slice %13 {offsets = [3, 0], sizes = [1, 128], strides = [1, 1]} : vector<8x128xf32> to vector<1x128xf32>
    %27 = arith.cmpf ogt, %26, %23 : vector<1x128xf32>
    %28 = arith.select %27, %26, %23 : vector<1x128xi1>, vector<1x128xf32>
    %c3_i32 = arith.constant 3 : i32
    %29 = vector.broadcast %c3_i32 : i32 to vector<1x128xi32>
    %30 = arith.select %27, %29, %25 : vector<1x128xi1>, vector<1x128xi32>
    %31 = vector.extract_strided_slice %13 {offsets = [4, 0], sizes = [1, 128], strides = [1, 1]} : vector<8x128xf32> to vector<1x128xf32>
    %32 = arith.cmpf ogt, %31, %28 : vector<1x128xf32>
    %33 = arith.select %32, %31, %28 : vector<1x128xi1>, vector<1x128xf32>
    %c4_i32 = arith.constant 4 : i32
    %34 = vector.broadcast %c4_i32 : i32 to vector<1x128xi32>
    %35 = arith.select %32, %34, %30 : vector<1x128xi1>, vector<1x128xi32>
    %36 = vector.extract_strided_slice %13 {offsets = [5, 0], sizes = [1, 128], strides = [1, 1]} : vector<8x128xf32> to vector<1x128xf32>
    %37 = arith.cmpf ogt, %36, %33 : vector<1x128xf32>
    %38 = arith.select %37, %36, %33 : vector<1x128xi1>, vector<1x128xf32>
    %c5_i32 = arith.constant 5 : i32
    %39 = vector.broadcast %c5_i32 : i32 to vector<1x128xi32>
    %40 = arith.select %37, %39, %35 : vector<1x128xi1>, vector<1x128xi32>
    %41 = vector.extract_strided_slice %13 {offsets = [6, 0], sizes = [1, 128], strides = [1, 1]} : vector<8x128xf32> to vector<1x128xf32>
    %42 = arith.cmpf ogt, %41, %38 : vector<1x128xf32>
    %43 = arith.select %42, %41, %38 : vector<1x128xi1>, vector<1x128xf32>
    %c6_i32 = arith.constant 6 : i32
    %44 = vector.broadcast %c6_i32 : i32 to vector<1x128xi32>
    %45 = arith.select %42, %44, %40 : vector<1x128xi1>, vector<1x128xi32>
    %46 = vector.extract_strided_slice %13 {offsets = [7, 0], sizes = [1, 128], strides = [1, 1]} : vector<8x128xf32> to vector<1x128xf32>
    %47 = arith.cmpf ogt, %46, %43 : vector<1x128xf32>
    %c7_i32 = arith.constant 7 : i32
    %48 = vector.broadcast %c7_i32 : i32 to vector<1x128xi32>
    %49 = arith.select %47, %48, %45 : vector<1x128xi1>, vector<1x128xi32>
    %c0_11 = arith.constant 0 : index
    %c0_12 = arith.constant 0 : index
    %50 = vector.load %arg6[%c0_11, %c0_12] : memref<1x128xi32, #tpu.memory_space<vmem>>, vector<1x128xi32>
    tpu.vector_store %arg6[%c0_11, %c0_12], %49 {strides = array<i32>} : memref<1x128xi32, #tpu.memory_space<vmem>>, vector<1x128xi32>,
    return
  }
  func.func @transform_0(%arg0: i32) -> (i32, i32) {
    %c0_i32 = arith.constant 0 : i32
    %c0_i32_0 = arith.constant 0 : i32
    return %c0_i32, %arg0 : i32, i32
  }
  func.func @transform_1(%arg0: i32) -> (i32, i32) {
    %c0_i32 = arith.constant 0 : i32
    %c0_i32_0 = arith.constant 0 : i32
    %c0_i32_1 = arith.constant 0 : i32
    return %c0_i32, %c0_i32_0 : i32, i32
  }
  func.func @transform_2(%arg0: i32) -> (i32, i32) {
    %c0_i32 = arith.constant 0 : i32
    %c0_i32_0 = arith.constant 0 : i32
    %c0_i32_1 = arith.constant 0 : i32
    return %c0_i32, %c0_i32_0 : i32, i32
  }
  func.func @transform_3(%arg0: i32) -> (i32, i32) {
    %c0_i32 = arith.constant 0 : i32
    %c0_i32_0 = arith.constant 0 : i32
    %c0_i32_1 = arith.constant 0 : i32
    return %c0_i32, %c0_i32_0 : i32, i32
  }
  func.func @transform_4(%arg0: i32) -> (i32, i32) {
    %c0_i32 = arith.constant 0 : i32
    %c0_i32_0 = arith.constant 0 : i32
    %c0_i32_1 = arith.constant 0 : i32
    return %c0_i32, %c0_i32_0 : i32, i32
  }
  func.func @transform_5(%arg0: i32) -> (i32, i32) {
    %c0_i32 = arith.constant 0 : i32
    %c0_i32_0 = arith.constant 0 : i32
    return %c0_i32, %arg0 : i32, i32
  }
}

</mosaic_0001>

<bundles_post_ra>
// kernel: tpu_custom_call.1
= control target key start
LH: loop header
LB: loop body
LE: loop exit
PB: predicated region body
PF: predicated region fallthrough
CT: control target
= control target key end

     0   :  { %10 = vsyncpa [#allocation4], 0  ;;  %s994_s0 = inlined_call_operand.vmem [shape: bf16[36,256], index: 0, kind: input, shape index: {}]   ;;  %s995_s1 = inlined_call_operand.hbm [shape: bf16[32,36], index: 1, kind: input, shape index: {}]   ;;  %s996_s2 = inlined_call_operand.vmem [shape: f32[32,1], index: 2, kind: input, shape index: {}]   ;;  %s997_s3 = inlined_call_operand.vmem [shape: bf16[8,32], index: 3, kind: input, shape index: {}]   ;;  %s998_s4 = inlined_call_operand.vmem [shape: f32[8,1], index: 4, kind: input, shape index: {}]   ;;  %s999_s5 = inlined_call_operand.hbm [shape: s32[1,256], index: 5, kind: output, shape index: {}]  }
   0x1   :  { %11 = vsyncpa [#allocation5], 0 }
   0x2   :  { %13 = vsyncpa [#allocation5 + $0x1], 0  ;;  %s844_s18 = smov 0   ;;  %s846_s19 = smov 0  }
   0x3   :  { %s848_s20 = smov 0   ;;  %s850_s21 = smov 0  }
   0x4 LB: > { %s865_s22 = sadd.s32 4294967295, %s805_s21   ;;  %s606_s23 = sadd.s32 4294967294, %s805_s21   ;;  %s805_s21 = sphi %s850_s21, %s1010_s21   ;;  %s801_s20 = sphi %s848_s20, %s1009_s20   ;;  %s797_s19 = sphi %s846_s19, %s1008_s19   ;;  %s793_s18 = sphi %s844_s18, %s1007_s18  }
   0x5   : > { %s869_s24 = sadd.s32 1, %s805_s21   ;;  %s26_s25 = sadd.s32 1, %s801_s20 }
   0x6   : > { %s23_s26 = ssub.s32 %s805_s21, %s869_s24  ;;  %p33_p0 = scmp.ne.s32.totalorder %s801_s20, %s797_s19 }
   0x7   : > { %p24_p1 = scmp.eq.s32.totalorder %s23_s26, 0  ;;  %p34_p2 = scmp.eq.s32.totalorder %s805_s21, 0 }
   0x8   : > { %p147_p3 = scmp.eq.s32.totalorder %s865_s22, 1  ;;  %p152_p4 = scmp.ne.s32.totalorder %s797_s19, %s793_s18 }
   0x9   : > { %s881_s27 = scalar_select %p24_p1, %s801_s20, %s26_s25  }
   0xa   : > { %p883_p5 = por %p34_p2, %p33_p0  ;;  %p887_p6 = por %p147_p3, %p33_p0 }
   0xb   : > { %p153_p7 = scmp.eq.s32.totalorder %s606_s23, 1  ;;  %p607_p8 = scmp.ge.s32.totalorder %s805_s21, 1 }
   0xc   : > { %s1002_s29 = scalar_select %p887_p6, 1, 0 }
   0xd   : > { %p160_p9 = scmp.lt.s32.totalorder %s805_s21, 3  ;;  %p893_p10 = por %p153_p7, %p152_p4 }
   0xe   : > { %p667_p11 = scmp.eq.s32.totalorder %s865_s22, 0  ;;  %s807_s7 = smov [#allocation3]  }
   0xf   : > { %s1003_s30 = scalar_select %p893_p10, 1, 0 }
  0x10   : > { %p898_p12 = pnand %p607_p8, %p160_p9  ;;  %s172_s8 = sshll.u32 %s807_s7, 4  ;;  %s173_s8 = int_to_ptr.vmem [resolvable:$true] %s172_s8 }
  0x11   : > { %s726_s9 = scalar_lea.vmem %s173_s8, 256  ;;  %p734_p7 = scmp.lt.s32.totalorder %s173_s8, %s173_s8 }
  0x12   : > { %p659_p13 = pneg %p898_p12  ;;  %p727_p2 = scmp.ne.s32.totalorder %s173_s8, %s726_s9 }
  0x13   : > { %p735_p10 = scmp.lt.s32.totalorder %s726_s9, %s726_s9 }
  0x14   : > { %p660_p0 = pnand %p667_p11, %p659_p13 }
  0x15   : > { %p736_p6 = por %p735_p10, %p734_p7 }
  0x16   : > { %p717_p1 = pneg %p660_p0 }
  0x18   : > { %p729_p3 = pnand %p727_p2, %p717_p1 }
  0x1a   : > { %p730_p4 = pneg %p729_p3 }
  0x1c   : > { %p737_p8 = pnand %p736_p6, %p730_p4 }
  0x1e   : > { %740 = shalt.err (!%p737_p8)
}
  0x1f   : > { %s808_s10 = smov 64   ;;  %s809_s11 = smov 4  }
  0x20   : > { %662 = dma.hbm_to_vmem [thread:$0]  (!%p660_p0), %s995_s1, 256, %s173_s8, [#allocation4], %s808_s10, %s808_s10, %s809_s11  }
  0x21   : > { %p609_p9 = scmp.ge.s32.totalorder %s805_s21, 2 }
  0x23   : > { %191 = sbr.rel (%p609_p9) target bundleno = 48 (0x30), region = 32 }
  0x28   : > { %194 = sbr.rel (!%p883_p5) target bundleno = 48 (0x30), region = 36  ;;  %s196_s14 = sand.u32 (%p883_p5), 1, %s801_s20  }
  0x29   : > { %s610_s15 = sshll.u32 (%p883_p5), %s805_s21, 2  ;;  %s651_s16 = smul.u32 (%p883_p5), 20, %s196_s14 }
  0x2a   : > { %s200_s25 = scalar_lea.vmem (%p883_p5), %s994_s0, %s610_s15 }
  0x2b   : > { %v217_v0 = vld [vmem:[%s200_s25] sm:$0xf] (%p883_p5)  ;;  %v219_v1 = vld [vmem:[%s200_s25 + $0x8] sm:$0xf] (%p883_p5)  ;;  %v221_v2 = vld [vmem:[%s200_s25 + $0x10] sm:$0xf] (%p883_p5) }
  0x2c   : > { %v223_v3 = vld [vmem:[%s200_s25 + $0x18] sm:$0xf] (%p883_p5)  ;;  %v225_v4 = vld [vmem:[%s200_s25 + $0x20] sm:$0xf] (%p883_p5)  ;;  %s198_s26 = scalar_lea.vmem (%p883_p5), [#allocation2], %s651_s16 }
  0x2d   : > { %218 = vst [vmem:[%s198_s26] sm:$0xf] %v217_v0  ;;  %220 = vst [vmem:[%s198_s26 + $0x4] sm:$0xf] %v219_v1 }
  0x2e   : > { %222 = vst [vmem:[%s198_s26 + $0x8] sm:$0xf] %v221_v2  ;;  %224 = vst [vmem:[%s198_s26 + $0xc] sm:$0xf] %v223_v3 }
  0x2f   : > { %226 = vst [vmem:[%s198_s26 + $0x10] sm:$0xf] %v225_v4 }
  0x30 PF: > { %263 = sbr.rel (%p898_p12) target bundleno = 514 (0x202), region = 77  ;;  %s922_s28 = sand.u32 (!%p898_p12), 1, %s797_s19  }
  0x31   : > { %s652_s7 = smul.u32 (!%p898_p12), 20, %s922_s28 }
  0x33   : > { %s268_s8 = scalar_lea.vmem (!%p898_p12), [#allocation2], %s652_s7 }
  0x35   : > { %784 = dma.done.wait (%p667_p11), [#allocation4], 256  }
  0x36   : > { %786 = vsyncadd (%p667_p11), [#allocation4], 4294967040  ;;  %v810_v5 = vmov 0   ;;  %vm362_vm0 = vcmask 1041408   ;;  %v711_v7 = vld [vmem:[%s268_s8 + $0x8] sm:$0xff]   ;;  %vm355_vm1 = vcmask 293888  }
  0x37   : > { %708 = vset.pattern.permute.xlu0 %v810_v5  ;;  %709 = vset.pattern.permute.xlu1 %v810_v5  ;;  %v710_v6 = vld [vmem:[%s268_s8 + $0x10] ss:$0 sps:$4 sm:$0x33]   ;;  %v713_v9 = vld [vmem:[#allocation3] sm:$0xff]   ;;  %v712_v10 = vld [vmem:[%s268_s8] sm:$0xff]   ;;  %v811_v17 = vmov 0.0  }
  0x38   : > { %650 = vmatprep.subr.msk.bf16.mxu0 %vm362_vm0, %v710_v6  ;;  %v364_v8 = vsel %vm362_vm0, %v710_v6, 0  ;;  %v308_v11 = vld [vmem:[%s996_s2 + $0x10] sm:$0xff]  ;;  %638 = vmatprep.mubr.msk.bf16.mxu0 %vm355_vm1, %v713_v9  ;;  %v306_v12 = vld [vmem:[%s996_s2] sm:$0xff]  ;;  %v309_v13 = vld [vmem:[%s996_s2 + $0x18] sm:$0xff]  ;;  %vm812_vm2 = vmmov 0   ;;  %vm428_vm3 = vcmask 261120  }
  0x39   : > { %633 = vmatpush3.bf16.msra.mxu0 %v364_v8  ;;  %322 = vperm.xlu0 %708, %v308_v11   ;;  %v307_v14 = vld [vmem:[%s996_s2 + $0x8] sm:$0xff]  ;;  %v714_v15 = vld [vmem:[#allocation3 + $0x8] sm:$0xff]   ;;  %v422_v16 = vld [vmem:[%s998_s4] sm:$0xff]  ;;  %s621_s26 = sshll.u32 %s865_s22, 4  ;;  %s295_s7 = scalar_lea.vmem [#allocation6], %s922_s28 }
  0x3a   : > { %634 = vmatprep.subr.bf16.mxu0 %v711_v7  ;;  %312 = vperm.xlu1 %709, %v306_v12   ;;  %v419_v36 = vld [vmem:[%s997_s3] sm:$0xf]  ;;  %s533_s8 = sshll.u32 %s295_s7, 4  ;;  %s957_s10 = scalar_lea.hbm %s999_s5, %s621_s26  ;;  %s534_s8 = int_to_ptr.vmem [resolvable:$true] %s533_s8 }
  0x3b   : > { %642 = vmatprep.subr.bf16.mxu1 %v811_v17  ;;  %646 = vmatprep.mubr.msk.bf16.mxu1 %vm812_vm2, %v811_v17  ;;  %s521_s11 = scalar_lea.sflag [#allocation5], %s922_s28  ;;  %s741_s12 = scalar_lea.vmem %s534_s8, 16 }
  0x3c   : > { %p742_p5 = scmp.ne.s32.totalorder %s534_s8, %s741_s12  ;;  %p1005_p6 = scmp.ne.s32.totalorder %s1002_s29, 0 }
  0x3d   : > { %635 = vmatpush3.bf16.msra.mxu0 %v711_v7  ;;  %327 = vperm.xlu0 %708, %v309_v13   ;;  %s813_s22 = smov [#allocation6]  }
  0x3e   : > { %636 = vmatprep.subr.bf16.mxu0 %v712_v10  ;;  %317 = vperm.xlu1 %709, %v307_v14   ;;  %p743_p10 = pnand %p742_p5, %p1005_p6  ;;  %s745_s13 = sshll.u32 %s813_s22, 4  ;;  %s746_s13 = int_to_ptr.vmem [resolvable:$false] %s745_s13 }
  0x3f   : > { %s747_s14 = scalar_lea.vmem %s746_s13, 32  ;;  %p748_p12 = scmp.lt.s32.totalorder %s534_s8, %s746_s13 }
  0x40   : > { %p744_p11 = pneg %p743_p10  ;;  %p749_p13 = scmp.lt.s32.totalorder %s747_s14, %s741_s12 }
  0x41   : > { %637 = vmatpush3.bf16.msra.mxu0 %v712_v10  ;;  %425 = vperm.xlu0 %708, %v422_v16  }
  0x42   : > { %p750_p0 = por %p749_p13, %p748_p12 }
  0x44   : > { %639 = vmatmul.mubr.msk.bf16.vlgmr.msra.gmra.mxu0 %vm355_vm1, %v714_v15  ;;  %p751_p1 = pnand %p750_p0, %p744_p11 }
  0xb4   : > { %v323_v18 = vpop.permute.xlu0 %322 }
  0xb5   : > { %v313_v19 = vpop.permute.xlu1 %312 }
  0xb8   : > { %v328_v23 = vpop.permute.xlu0 %327 }
  0xb9   : > { %v318_v26 = vpop.permute.xlu1 %317 }
  0xbc   : > { %v426_v37 = vpop.permute.xlu0 %425 }
 0x104   : > { %v640_v20 = vpop.f32.mrf.mxu0 }
 0x105   : > { %v409_v22 = vadd.f32 %v640_v20, %v323_v18 }
 0x106   : > { %v400_v21 = vpop.f32.mrf.mxu0 }
 0x107   : > { %v417_v28 = vmax.f32 %v409_v22, 0.0  ;;  %v401_v29 = vadd.f32 %v400_v21, %v313_v19 }
 0x108   : > { %v641_v24 = vpop.f32.mrf.mxu0 }
 0x109   : > { %v412_v25 = vadd.f32 %v641_v24, %v328_v23  ;;  %v415_v34 = vmax.f32 %v401_v29, 0.0 }
 0x10a   : > { %v403_v27 = vpop.f32.mrf.mxu0 }
 0x10b   : > { %v418_v30 = vmax.f32 %v412_v25, 0.0  ;;  %v404_v31 = vadd.f32 %v403_v27, %v318_v26 }
 0x10d   : > { %v416_v32 = vmax.f32 %v404_v31, 0.0  ;;  %v421_v33 = vpack.c.bf16 %v418_v30, %v417_v28 }
 0x10f   : > { %643 = vmatpush3.bf16.msra.mxu1 %v421_v33  ;;  %v420_v35 = vpack.c.bf16 %v416_v32, %v415_v34 }
 0x110   : > { %644 = vmatprep.subr.bf16.mxu1 %v811_v17 }
 0x113   : > { %645 = vmatpush3.bf16.msra.mxu1 %v420_v35 }
 0x116   : > { %647 = vmatmul.mubr.msk.bf16.vlgmr.msra.gmra.mxu1 %vm428_vm3, %v419_v36 }
 0x1d6   : > { %v466_v38 = vpop.f32.mrf.mxu1 }
 0x1d7   : > { %v467_v39 = vadd.f32 %v466_v38, %v426_v37 }
 0x1d8   : > { %v648_v40 = vpop.f32.mrf.mxu1 }
 0x1d9   : > { %v473_v41 = vrot.slane %v467_v39, 7 }
 0x1da   : > { %v469_v42 = vpop.f32.mrf.mxu1 }
 0x1db   : > { %vm475_vm4 = vcmp.gt.f32.partialorder %v467_v39, %v473_v41 }
 0x1dc   : > { %v649_v43 = vpop.f32.mrf.mxu1  ;;  %v476_v44 = vsel %vm475_vm4, %v467_v39, %v473_v41  ;;  %v477_v45 = vsel %vm475_vm4, 1, %v810_v5 }
 0x1dd   : > { %v479_v46 = vrot.slane %v476_v44, 7  ;;  %v483_v47 = vrot.slane %v477_v45, 7 }
 0x1df   : > { %vm481_vm5 = vcmp.gt.f32.partialorder %v467_v39, %v479_v46 }
 0x1e0   : > { %v482_v48 = vsel %vm481_vm5, %v467_v39, %v479_v46  ;;  %v484_v49 = vsel %vm481_vm5, 2, %v483_v47 }
 0x1e1   : > { %v486_v50 = vrot.slane %v482_v48, 7  ;;  %v490_v51 = vrot.slane %v484_v49, 7 }
 0x1e3   : > { %vm488_vm6 = vcmp.gt.f32.partialorder %v467_v39, %v486_v50 }
 0x1e4   : > { %v489_v52 = vsel %vm488_vm6, %v467_v39, %v486_v50  ;;  %v491_v53 = vsel %vm488_vm6, 3, %v490_v51 }
 0x1e5   : > { %v493_v54 = vrot.slane %v489_v52, 7  ;;  %v497_v55 = vrot.slane %v491_v53, 7 }
 0x1e7   : > { %vm495_vm7 = vcmp.gt.f32.partialorder %v467_v39, %v493_v54 }
 0x1e8   : > { %v496_v56 = vsel %vm495_vm7, %v467_v39, %v493_v54  ;;  %v498_v57 = vsel %vm495_vm7, 4, %v497_v55 }
 0x1e9   : > { %v500_v58 = vrot.slane %v496_v56, 7  ;;  %v504_v59 = vrot.slane %v498_v57, 7 }
 0x1eb   : > { %vm502_vm8 = vcmp.gt.f32.partialorder %v467_v39, %v500_v58 }
 0x1ec   : > { %v503_v60 = vsel %vm502_vm8, %v467_v39, %v500_v58  ;;  %v505_v61 = vsel %vm502_vm8, 5, %v504_v59 }
 0x1ed   : > { %v507_v62 = vrot.slane %v503_v60, 7  ;;  %v511_v63 = vrot.slane %v505_v61, 7 }
 0x1ef   : > { %vm509_vm9 = vcmp.gt.f32.partialorder %v467_v39, %v507_v62 }
 0x1f0   : > { %v510_v0 = vsel %vm509_vm9, %v467_v39, %v507_v62  ;;  %v512_v1 = vsel %vm509_vm9, 6, %v511_v63 }
 0x1f1   : > { %v514_v2 = vrot.slane %v510_v0, 7  ;;  %v517_v3 = vrot.slane %v512_v1, 7 }
 0x1f3   : > { %vm516_vm10 = vcmp.gt.f32.partialorder %v467_v39, %v514_v2 }
 0x1f4   : > { %v518_v4 = vsel %vm516_vm10, 7, %v517_v3 }
 0x1f5   : > { %519 = vst [vmem:[%s295_s7 - $0x7] sm:$0x80] %v518_v4 }
 0x1f6   : > { %754 = shalt.err (!%p751_p1)
}
 0x1f7   : > { %s755_s15 = scalar_lea.hbm %s957_s10, 16  ;;  %s759_s17 = scalar_lea.hbm %s999_s5, 32 }
 0x1f8   : > { %p756_p2 = scmp.ne.s32.totalorder %s957_s10, %s755_s15  ;;  %p760_p7 = scmp.lt.s32.totalorder %s957_s10, %s999_s5 }
 0x1f9   : > { %p761_p8 = scmp.lt.s32.totalorder %s759_s17, %s755_s15 }
 0x1fa   : > { %p757_p3 = pnand %p756_p2, %p1005_p6 }
 0x1fb   : > { %p762_p5 = por %p761_p8, %p760_p7 }
 0x1fc   : > { %p758_p4 = pneg %p757_p3 }
 0x1fe   : > { %p763_p10 = pnand %p762_p5, %p758_p4 }
 0x200   : > { %766 = shalt.err (!%p763_p10)
}
 0x201   : > { %657 = dma.vmem_to_hbm [thread:$0]  (%p1005_p6), %s534_s8, 16, %s957_s10, %s521_s11  }
 0x202 PF: > { %s545_s26 = sand.u32 1, %s793_s18   ;;  %p1006_p11 = scmp.ne.s32.totalorder %s1003_s30, 0 }
 0x203   : > { %s546_s7 = scalar_lea.sflag [#allocation5], %s545_s26 }
 0x204   : > { %p664_p12 = pnand %p609_p9, %p1006_p11 }
 0x206   : > { %p665_p13 = pneg %p664_p12 }
 0x208   : > { %788 = dma.done.wait (%p665_p13), %s546_s7, 16  }
 0x209   : > { %790 = vsyncadd (%p665_p13), %s546_s7, 4294967280  ;;  %p16_p0 = scmp.ge.s32.totalorder %s869_s24, 4   ;;  %s1007_s18 = smov %s797_s19 }
 0x20a   : > { %s1008_s19 = smov %s801_s20  ;;  %s1009_s20 = smov %s881_s27 }
 0x20b   : > { %s1010_s21 = smov %s869_s24  ;;  %18 = sbr.rel (!%p16_p0) target bundleno = 4 (0x4), region = 126 }
 0x210   :  { %550 = vsyncpa [#allocation4], 1 }
 0x211   :  { %552 = vsyncpa [#allocation4 + $0x1], 1 }
 0x212   :  { %553 = vsyncpa [#allocation5], 1 }
 0x213   :  { %555 = vsyncpa [#allocation5 + $0x1], 1 }

</bundles_post_ra>
